<compile_context>
chip_gen: v6e
topology: v6e:2x2x1
jax: 0.10.0
libtpu: 0.0.40
codegen_flags: <defaults>
</compile_context>

<pallas_src>
import jax
import jax.numpy as jnp
from jax import lax
from jax.experimental import pallas as pl
from jax.experimental.pallas import tpu as pltpu


def _coda_prompt_kernel(x_ref, k_ref, a_ref, p_ref, o_ref):
    x = x_ref[...]                      # (B, D)   f32
    K = k_ref[...]                      # (Ks, D)  f32
    A = a_ref[...]                      # (Ks, D)  f32

    eps = 1e-12
    # Row-normalize K (torch F.normalize semantics: clamp_min(eps)).
    k_norm = jnp.sqrt(jnp.sum(K * K, axis=-1, keepdims=True))          # (Ks, 1)
    n_K = K * (1.0 / jnp.maximum(k_norm, eps))                          # (Ks, D)

    # Contract last dims directly (no .T / XLU transpose before the MXU push).
    contract = (((1,), (1,)), ((), ()))
    # numer[b,k] = sum_d x[b,d] * A[k,d] * n_K[k,d]
    numer = lax.dot_general(x, A * n_K, contract,
                            preferred_element_type=jnp.float32)         # (B, Ks)
    # ||x[b]*A[k]||^2 = sum_d x[b,d]^2 * A[k,d]^2
    xa_sq = lax.dot_general(x * x, A * A, contract,
                            preferred_element_type=jnp.float32)         # (B, Ks)
    aq_k = numer / jnp.maximum(jnp.sqrt(xa_sq), eps)                     # (B, Ks)

    # P_flat = aq_k @ p_flat   -> lane-dense (B, L*emb_d) store.
    o_ref[...] = jnp.dot(aq_k, p_ref[...],
                         preferred_element_type=jnp.float32).astype(o_ref.dtype)


def coda_prompt_forward(x_querry, K, A, p, *, task_count, n_tasks, train=False):
    """Forward values of CodaPrompt for one e-layer.

    x_querry: [B, key_dim]; K, A: [pool, key_dim]; p: [pool, L, emb_d].
    Returns (Ek, Ev, loss) with Ek/Ev: [B, L//2, emb_d].
    """
    B, D = x_querry.shape
    pool, L, E = p.shape
    pt = pool // n_tasks
    f = (task_count + 1) * pt

    # Value-wise, both the train and eval branches of the reference use rows
    # [0:f] (detach/clone only affect autograd, not forward values).
    x = x_querry.astype(jnp.float32)
    K_s = K[:f].astype(jnp.float32)
    A_s = A[:f].astype(jnp.float32)
    p_flat = p[:f].reshape(f, L * E).astype(jnp.float32)

    P_flat = pl.pallas_call(
        _coda_prompt_kernel,
        out_shape=jax.ShapeDtypeStruct((B, L * E), x_querry.dtype),
        grid_spec=pltpu.PrefetchScalarGridSpec(
            num_scalar_prefetch=0,
            grid=(1,),                               # single step: everything in VMEM
            in_specs=[
                pl.BlockSpec((B, D), lambda i: (0, 0)),        # x_querry
                pl.BlockSpec((f, D), lambda i: (0, 0)),        # K[:f]
                pl.BlockSpec((f, D), lambda i: (0, 0)),        # A[:f]
                pl.BlockSpec((f, L * E), lambda i: (0, 0)),    # p[:f] flattened
            ],
            out_specs=pl.BlockSpec((B, L * E), lambda i: (0, 0)),
        ),
        compiler_params=pltpu.CompilerParams(
            dimension_semantics=("arbitrary",)),
    )(x, K_s, A_s, p_flat)

    P_ = P_flat.reshape(B, L, E)
    i = L // 2
    Ek, Ev = P_[:, :i, :], P_[:, i:, :]
    # TODO(synk): ortho-penalty training loss (train=True and ortho_mu>0) not implemented;
    # forward returns loss=0 (eval semantics).
    loss = 0.0
    return Ek, Ev, loss


def _reference(x_querry, K, A, p, *, task_count, n_tasks):
    pool = K.shape[0]
    pt = pool // n_tasks
    f = (task_count + 1) * pt
    K, A, p = K[:f], A[:f], p[:f]
    a_querry = jnp.einsum('bd,kd->bkd', x_querry, A)
    n_K = K / jnp.maximum(jnp.linalg.norm(K, axis=1, keepdims=True), 1e-12)
    q = a_querry / jnp.maximum(jnp.linalg.norm(a_querry, axis=2, keepdims=True), 1e-12)
    aq_k = jnp.einsum('bkd,kd->bk', q, n_K)
    P_ = jnp.einsum('bk,kld->bld', aq_k, p)
    i = p.shape[1] // 2
    return P_[:, :i, :], P_[:, i:, :]


if __name__ == "__main__":
    # Small shapes consistent with the module: B queries of dim key_dim,
    # a prompt pool of size e_pool_size with length e_p_length and width emb_d.
    B = 2
    emb_d = 128
    key_dim = 128
    e_pool_size = 16
    e_p_length = 8
    n_tasks = 4
    task_count = 0          # -> forward uses rows [0 : pool/n_tasks) = [0:4)

    key = jax.random.PRNGKey(0)
    kx, kk, ka, kp = jax.random.split(key, 4)
    x_querry = jax.random.normal(kx, (B, key_dim), dtype=jnp.float32)
    K = jax.random.normal(kk, (e_pool_size, key_dim), dtype=jnp.float32)
    A = jax.random.normal(ka, (e_pool_size, key_dim), dtype=jnp.float32)
    p = jax.random.normal(kp, (e_pool_size, e_p_length, emb_d), dtype=jnp.float32)

    Ek, Ev, loss = coda_prompt_forward(
        x_querry, K, A, p, task_count=task_count, n_tasks=n_tasks, train=False)
    Ek, Ev = jax.block_until_ready((Ek, Ev))

    Ek_ref, Ev_ref = _reference(
        x_querry, K, A, p, task_count=task_count, n_tasks=n_tasks)

    assert Ek.shape == (B, e_p_length // 2, emb_d)
    assert Ev.shape == (B, e_p_length // 2, emb_d)
    assert jnp.allclose(Ek, Ek_ref, atol=1e-4, rtol=1e-4), "Ek mismatch vs reference"
    assert jnp.allclose(Ev, Ev_ref, atol=1e-4, rtol=1e-4), "Ev mismatch vs reference"
    assert loss == 0.0

    print("KERNEL_OK")
</pallas_src>

<mosaic_0001>
module attributes {stable_mosaic.version = 11 : i64} {
  func.func @_coda_prompt_kernel(%arg0: i32, %arg1: memref<2x128xf32, #tpu.memory_space<vmem>>, %arg2: memref<4x128xf32, #tpu.memory_space<vmem>>, %arg3: memref<4x128xf32, #tpu.memory_space<vmem>>, %arg4: memref<4x1024xf32, #tpu.memory_space<vmem>>, %arg5: memref<2x1024xf32, #tpu.memory_space<vmem>>) attributes {dimension_semantics = [#tpu.dimension_semantics<arbitrary>], iteration_bounds = array<i64: 1>, scalar_prefetch = 0 : i64, scratch_operands = 0 : i64, tpu.core_type = #tpu.core_type<tc>, window_params = [{pipeline_mode = #tpu.pipeline_mode<synchronous>, transform_indices = @transform_0, window_bounds = array<i64: 2, 128>}, {pipeline_mode = #tpu.pipeline_mode<synchronous>, transform_indices = @transform_1, window_bounds = array<i64: 4, 128>}, {pipeline_mode = #tpu.pipeline_mode<synchronous>, transform_indices = @transform_2, window_bounds = array<i64: 4, 128>}, {pipeline_mode = #tpu.pipeline_mode<synchronous>, transform_indices = @transform_3, window_bounds = array<i64: 4, 1024>}, {pipeline_mode = #tpu.pipeline_mode<synchronous>, transform_indices = @transform_4, window_bounds = array<i64: 2, 1024>}]} {
    %c0 = arith.constant 0 : index
    %c0_0 = arith.constant 0 : index
    %0 = vector.load %arg1[%c0, %c0_0] : memref<2x128xf32, #tpu.memory_space<vmem>>, vector<2x128xf32>
    %c0_1 = arith.constant 0 : index
    %c0_2 = arith.constant 0 : index
    %1 = vector.load %arg2[%c0_1, %c0_2] : memref<4x128xf32, #tpu.memory_space<vmem>>, vector<4x128xf32>
    %c0_3 = arith.constant 0 : index
    %c0_4 = arith.constant 0 : index
    %2 = vector.load %arg3[%c0_3, %c0_4] : memref<4x128xf32, #tpu.memory_space<vmem>>, vector<4x128xf32>
    %3 = arith.mulf %1, %1 : vector<4x128xf32>
    %cst = arith.constant dense<0.000000e+00> : vector<4xf32>
    %4 = vector.multi_reduction <add>, %3, %cst [1] : vector<4x128xf32> to vector<4xf32>
    %5 = vector.shape_cast %4 : vector<4xf32> to vector<4x1xf32>
    %6 = math.sqrt %5 : vector<4x1xf32>
    %cst_5 = arith.constant 9.99999996E-13 : f32
    %7 = vector.broadcast %cst_5 : f32 to vector<4x1xf32>
    %8 = arith.maximumf %6, %7 : vector<4x1xf32>
    %cst_6 = arith.constant 1.000000e+00 : f32
    %9 = vector.broadcast %cst_6 : f32 to vector<4x1xf32>
    %10 = arith.divf %9, %8 : vector<4x1xf32>
    %11 = vector.broadcast %10 : vector<4x1xf32> to vector<4x128xf32>
    %12 = arith.mulf %1, %11 : vector<4x128xf32>
    %13 = arith.mulf %2, %12 : vector<4x128xf32>
    %cst_7 = arith.constant dense<0.000000e+00> : vector<2x4xf32>
    %14 = tpu.matmul %0, %13, %cst_7 {dimension_numbers = #tpu.dot_dimension_numbers<[1], [1], [0], [0], [0, 0, 1, 0], [], []>} : vector<2x128xf32>, vector<4x128xf32>, vector<2x4xf32> -> vector<2x4xf32>
    %15 = arith.mulf %0, %0 : vector<2x128xf32>
    %16 = arith.mulf %2, %2 : vector<4x128xf32>
    %cst_8 = arith.constant dense<0.000000e+00> : vector<2x4xf32>
    %17 = tpu.matmul %15, %16, %cst_8 {dimension_numbers = #tpu.dot_dimension_numbers<[1], [1], [0], [0], [0, 0, 1, 0], [], []>} : vector<2x128xf32>, vector<4x128xf32>, vector<2x4xf32> -> vector<2x4xf32>
    %18 = math.sqrt %17 : vector<2x4xf32>
    %cst_9 = arith.constant 9.99999996E-13 : f32
    %19 = vector.broadcast %cst_9 : f32 to vector<2x4xf32>
    %20 = arith.maximumf %18, %19 : vector<2x4xf32>
    %21 = arith.divf %14, %20 : vector<2x4xf32>
    %c0_10 = arith.constant 0 : index
    %c0_11 = arith.constant 0 : index
    %22 = vector.load %arg4[%c0_10, %c0_11] : memref<4x1024xf32, #tpu.memory_space<vmem>>, vector<4x1024xf32>
    %cst_12 = arith.constant dense<0.000000e+00> : vector<2x1024xf32>
    %23 = tpu.matmul %21, %22, %cst_12 {dimension_numbers = #tpu.dot_dimension_numbers<[1], [0], [0], [1], [0, 0, 1, 1], [], []>} : vector<2x4xf32>, vector<4x1024xf32>, vector<2x1024xf32> -> vector<2x1024xf32>
    %c0_13 = arith.constant 0 : index
    %c0_14 = arith.constant 0 : index
    %24 = vector.load %arg5[%c0_13, %c0_14] : memref<2x1024xf32, #tpu.memory_space<vmem>>, vector<2x1024xf32>
    tpu.vector_store %arg5[%c0_13, %c0_14], %23 {strides = array<i32>} : memref<2x1024xf32, #tpu.memory_space<vmem>>, vector<2x1024xf32>,
    return
  }
  func.func @transform_0(%arg0: i32) -> (i32, i32) {
    %c0_i32 = arith.constant 0 : i32
    %c0_i32_0 = arith.constant 0 : i32
    %c0_i32_1 = arith.constant 0 : i32
    return %c0_i32, %c0_i32_0 : i32, i32
  }
  func.func @transform_1(%arg0: i32) -> (i32, i32) {
    %c0_i32 = arith.constant 0 : i32
    %c0_i32_0 = arith.constant 0 : i32
    %c0_i32_1 = arith.constant 0 : i32
    return %c0_i32, %c0_i32_0 : i32, i32
  }
  func.func @transform_2(%arg0: i32) -> (i32, i32) {
    %c0_i32 = arith.constant 0 : i32
    %c0_i32_0 = arith.constant 0 : i32
    %c0_i32_1 = arith.constant 0 : i32
    return %c0_i32, %c0_i32_0 : i32, i32
  }
  func.func @transform_3(%arg0: i32) -> (i32, i32) {
    %c0_i32 = arith.constant 0 : i32
    %c0_i32_0 = arith.constant 0 : i32
    %c0_i32_1 = arith.constant 0 : i32
    return %c0_i32, %c0_i32_0 : i32, i32
  }
  func.func @transform_4(%arg0: i32) -> (i32, i32) {
    %c0_i32 = arith.constant 0 : i32
    %c0_i32_0 = arith.constant 0 : i32
    %c0_i32_1 = arith.constant 0 : i32
    return %c0_i32, %c0_i32_0 : i32, i32
  }
}

</mosaic_0001>

<bundles_post_ra>
// kernel: tpu_custom_call.1
= control target key start
LH: loop header
LB: loop body
LE: loop exit
PB: predicated region body
PF: predicated region fallthrough
CT: control target
= control target key end

     0   :  { %9 = vsyncpa [#allocation3], 0  ;;  %s835_s0 = inlined_call_operand.hbm [shape: f32[2,128], index: 0, kind: input, shape index: {}]   ;;  %s836_s1 = inlined_call_operand.hbm [shape: f32[4,128], index: 1, kind: input, shape index: {}]   ;;  %s837_s2 = inlined_call_operand.hbm [shape: f32[4,128], index: 2, kind: input, shape index: {}]   ;;  %s838_s3 = inlined_call_operand.hbm [shape: f32[4,1024], index: 3, kind: input, shape index: {}]   ;;  %s839_s4 = inlined_call_operand.hbm [shape: f32[2,1024], index: 4, kind: output, shape index: {}]  }
   0x1   :  { %10 = vsyncpa [#allocation6], 0 }
   0x2   :  { %11 = vsyncpa [#allocation9], 0 }
   0x3   :  { %12 = vsyncpa [#allocation4], 0  ;;  %s770_s15 = smov [#allocation5]   ;;  %s771_s17 = smov [#allocation2]  }
   0x4   :  { %s29_s16 = sshll.u32 %s770_s15, 4  ;;  %s19_s18 = sshll.u32 %s771_s17, 4  ;;  %s30_s16 = int_to_ptr.vmem [resolvable:$true] %s29_s16  ;;  %s20_s18 = int_to_ptr.vmem [resolvable:$true] %s19_s18 }
   0x5   :  { %s670_s19 = scalar_lea.vmem %s30_s16, 64  ;;  %p675_p1 = scmp.lt.s32.totalorder %s30_s16, %s30_s16 }
   0x6   :  { %p671_p0 = scmp.ne.s32.totalorder %s30_s16, %s670_s19  ;;  %p676_p2 = scmp.lt.s32.totalorder %s670_s19, %s670_s19 }
   0x8   :  { %p677_p3 = por %p676_p2, %p675_p1 }
   0xa   :  { %p678_p4 = pnand %p677_p3, %p671_p0 }
   0xc   :  { %681 = shalt.err (!%p678_p4)
}
   0xd   :  { %32 = dma.hbm_to_vmem [thread:$0]  %s836_s1, 64, %s30_s16, [#allocation6]  }
   0xe   :  { %s690_s22 = scalar_lea.vmem %s20_s18, 32  ;;  %p695_p6 = scmp.lt.s32.totalorder %s20_s18, %s20_s18 }
   0xf   :  { %p691_p5 = scmp.ne.s32.totalorder %s20_s18, %s690_s22  ;;  %p696_p7 = scmp.lt.s32.totalorder %s690_s22, %s690_s22 }
  0x11   :  { %p697_p8 = por %p696_p7, %p695_p6 }
  0x13   :  { %p698_p9 = pnand %p697_p8, %p691_p5 }
  0x15   :  { %701 = shalt.err (!%p698_p9)
}
  0x16   :  { %22 = dma.hbm_to_vmem [thread:$0]  %s835_s0, 32, %s20_s18, [#allocation3]  }
  0x17   :  { %s772_s25 = smov [#allocation7]   ;;  %s773_s27 = smov [#allocation8]  }
  0x18   :  { %s39_s26 = sshll.u32 %s772_s25, 4  ;;  %s49_s28 = sshll.u32 %s773_s27, 4  ;;  %s40_s26 = int_to_ptr.vmem [resolvable:$true] %s39_s26  ;;  %s50_s28 = int_to_ptr.vmem [resolvable:$true] %s49_s28 }
  0x19   :  { %s710_s29 = scalar_lea.vmem %s40_s26, 64  ;;  %p715_p11 = scmp.lt.s32.totalorder %s40_s26, %s40_s26 }
  0x1a   :  { %p711_p10 = scmp.ne.s32.totalorder %s40_s26, %s710_s29  ;;  %p716_p12 = scmp.lt.s32.totalorder %s710_s29, %s710_s29 }
  0x1c   :  { %p717_p13 = por %p716_p12, %p715_p11 }
  0x1e   :  { %p718_p0 = pnand %p717_p13, %p711_p10 }
  0x20   :  { %721 = shalt.err (!%p718_p0)
}
  0x21   :  { %42 = dma.hbm_to_vmem [thread:$0]  %s837_s2, 64, %s40_s26, [#allocation6]  }
  0x22   :  { %s730_s5 = scalar_lea.vmem %s50_s28, 512  ;;  %p735_p2 = scmp.lt.s32.totalorder %s50_s28, %s50_s28 }
  0x23   :  { %p731_p1 = scmp.ne.s32.totalorder %s50_s28, %s730_s5  ;;  %p736_p3 = scmp.lt.s32.totalorder %s730_s5, %s730_s5 }
  0x25   :  { %p737_p4 = por %p736_p3, %p735_p2 }
  0x27   :  { %p738_p5 = pnand %p737_p4, %p731_p1 }
  0x29   :  { %741 = shalt.err (!%p738_p5)
}
  0x2a   :  { %52 = dma.hbm_to_vmem [thread:$0]  %s838_s3, 512, %s50_s28, [#allocation9]  }
  0x2b   :  { %762 = dma.done.wait [#allocation3], 32  }
  0x2c   :  { %763 = vsyncadd [#allocation3], 4294967264 }
  0x2d   :  { %764 = dma.done.wait [#allocation6], 128  }
  0x2e   :  { %765 = vsyncadd [#allocation6], 4294967168 }
  0x2f   :  { %766 = dma.done.wait [#allocation9], 512  }
  0x30   :  { %767 = vsyncadd [#allocation9], 4294966784  ;;  %v774_v0 = vmov 0.0   ;;  %vm775_vm0 = vmmov 0   ;;  %vm69_vm1 = vcmask 1043456   ;;  %v238_v8 = vld [vmem:[#allocation8 + $0x8] sm:$0xff]  ;;  %v566_v40 = vlaneseq }
  0x31   :  { %637 = vmatprep.subr.mxu1 %v774_v0  ;;  %639 = vmatprep.mubr.msk.f32.mxu1 %vm775_vm0, %v774_v0  ;;  %v66_v1 = vld [vmem:[#allocation5] sm:$0xf]  ;;  %v67_v2 = vld [vmem:[#allocation7] sm:$0xf]  ;;  %v65_v3 = vld [vmem:[#allocation2] sm:$0x3]  ;;  %v246_v9 = vcombine.high %v238_v8, %v238_v8 }
  0x32   :  { %632 = vmatprep.subr.mxu0 %v774_v0  ;;  %634 = vmatprep.mubr.msk.f32.mxu0 %vm775_vm0, %v774_v0  ;;  %v68_v4 = vmul.f32 %v66_v1, %v66_v1  ;;  %v156_v5 = vmul.f32 %v67_v2, %v67_v2  ;;  %v155_v6 = vmul.f32 %v65_v3, %v65_v3  ;;  %v237_v17 = vld [vmem:[#allocation8] sm:$0xff]  ;;  %v239_v24 = vld [vmem:[#allocation8 + $0x10] sm:$0xff]  ;;  %v240_v25 = vld [vmem:[#allocation8 + $0x18] sm:$0xff]  ;;  %vm249_vm6 = vcmask 31744   ;;  %s777_s2 = smov [#allocation10]  }
  0x33   :  { %v245_v20 = vcombine.high %v237_v17, %v237_v17  ;;  %v247_v26 = vcombine.high %v239_v24, %v239_v24  ;;  %v248_v27 = vcombine.high %v240_v25, %v240_v25  ;;  %v776_v38 = vmov 1983009808   ;;  %s605_s3 = sshll.u32 %s777_s2, 4  ;;  %s606_s3 = int_to_ptr.vmem [resolvable:$true] %s605_s3 }
  0x34   :  { %v70_v7 = vsel %vm69_vm1, %v68_v4, 0.0  ;;  %638 = vmatpush3.xpose.msra.mxu1 %v156_v5  ;;  %v564_v39 = vunpack.c.l.s4 %v776_v38  ;;  %v567_v42 = vshrl.u32 %v566_v40, 7  ;;  %s742_s7 = scalar_lea.vmem %s606_s3, 256  ;;  %p747_p7 = scmp.lt.s32.totalorder %s606_s3, %s606_s3 }
  0x35   :  { %71 = vadd.xlane.f32.xlu0 %v70_v7  ;;  %619 = vmatprep.subr.msk.mxu1 %vm69_vm1, %v246_v9  ;;  %p743_p6 = scmp.ne.s32.totalorder %s606_s3, %s742_s7  ;;  %p748_p8 = scmp.lt.s32.totalorder %s742_s7, %s742_s7 }
  0x36   :  { %v565_v41 = vunpack.c.0.s8 %v564_v39 }
  0x37   :  { %640 = vmatmul.mubr.f32.vlgmr.msra.gmra.mxu1 %v155_v6  ;;  %p749_p9 = por %p748_p8, %p747_p7 }
  0x38   :  { %404 = vmatprep.mubr.f32.mxu1 %v774_v0  ;;  %620 = vmatpush1.msk.msra.mxu1 %vm69_vm1, %v238_v8  ;;  %v568_v45 = vsub.s32 %v565_v41, %v567_v42 }
  0x39   :  { %625 = vmatprep.subr.msk.mxu1 %vm69_vm1, %v248_v27  ;;  %p750_p10 = pnand %p749_p9, %p743_p6 }
  0xbe   :  { %v72_v10 = vpop.xlane.xlu0 %71 }
  0xbf   :  { %654 = vrsqrt.f32 %v72_v10  ;;  %vm75_vm2 = vcmp.eq.f32.partialorder %v72_v10, inf  ;;  %v78_v13 = vand.u32 2147483648, %v72_v10  ;;  %vm77_vm3 = vcmp.eq.f32.partialorder %v72_v10, 0.0 }
  0xcc   :  { %v655_v11 = vpop.eup %654 }
  0xcd   :  { %v74_v12 = vmul.f32 %v655_v11, %v72_v10 }
  0xcf   :  { %v76_v14 = vsel %vm75_vm2, %v72_v10, %v74_v12 }
  0xd0   :  { %v79_v15 = vsel %vm77_vm3, %v78_v13, %v76_v14 }
  0xd1   :  { %v80_v16 = vmax.f32 %v79_v15, 1e-12 }
  0xd3   :  { %656 = vrcp.f32 %v80_v16 }
  0xe0   :  { %v657_v18 = vpop.eup %656 }
  0xe1   :  { %v83_v19 = vmul.f32 %v657_v18, %v66_v1 }
  0xe3   :  { %v84_v21 = vmul.f32 %v83_v19, %v67_v2 }
  0xe5   :  { %633 = vmatpush3.xpose.msra.mxu0 %v84_v21 }
  0xe6   :  { %616 = vmatprep.subr.msk.mxu0 %vm69_vm1, %v245_v20 }
  0xe8   :  { %635 = vmatmul.mubr.f32.vlgmr.msra.gmra.mxu0 %v65_v3 }
  0xe9   :  { %617 = vmatpush1.msk.msra.mxu0 %vm69_vm1, %v237_v17  ;;  %333 = vmatprep.mubr.f32.mxu0 %v774_v0 }
  0xea   :  { %622 = vmatprep.subr.msk.mxu0 %vm69_vm1, %v247_v26 }
  0xf7   :  { %v223_v22 = vpop.f32.mrf.mxu1 }
  0xf8   :  { %658 = vrsqrt.f32 %v223_v22  ;;  %vm229_vm4 = vcmp.eq.f32.partialorder %v223_v22, inf  ;;  %v232_v30 = vand.u32 2147483648, %v223_v22  ;;  %vm231_vm5 = vcmp.eq.f32.partialorder %v223_v22, 0.0 }
  0xf9   :  { %v641_v23 = vpop.f32.mrf.mxu1 }
 0x105   :  { %v659_v28 = vpop.eup %658 }
 0x106   :  { %v228_v29 = vmul.f32 %v659_v28, %v223_v22 }
 0x108   :  { %v230_v31 = vsel %vm229_vm4, %v223_v22, %v228_v29 }
 0x109   :  { %v233_v32 = vsel %vm231_vm5, %v232_v30, %v230_v31 }
 0x10a   :  { %v234_v33 = vmax.f32 %v233_v32, 1e-12 }
 0x10c   :  { %660 = vrcp.f32 %v234_v33 }
 0x119   :  { %v661_v34 = vpop.eup %660 }
 0x1a8   :  { %v151_v35 = vpop.f32.mrf.mxu0 }
 0x1a9   :  { %v236_v36 = vmul.f32 %v661_v34, %v151_v35 }
 0x1aa   :  { %v636_v37 = vpop.f32.mrf.mxu0 }
 0x1ab   :  { %618 = vmatmul.mubr.msk.f32.vlgmr.msra.gmra.mxu0 %vm249_vm6, %v236_v36  ;;  %621 = vmatmul.mubr.msk.f32.vlgmr.msra.gmra.mxu1 %vm249_vm6, %v236_v36 }
 0x1ac   :  { %623 = vmatpush1.msk.msra.mxu0 %vm69_vm1, %v239_v24  ;;  %626 = vmatpush1.msk.msra.mxu1 %vm69_vm1, %v240_v25 }
 0x1ad   :  { %475 = vmatprep.mubr.f32.mxu0 %v774_v0  ;;  %546 = vmatprep.mubr.f32.mxu1 %v774_v0 }
 0x1af   :  { %624 = vmatmul.mubr.msk.f32.vlgmr.msra.gmra.mxu0 %vm249_vm6, %v236_v36  ;;  %627 = vmatmul.mubr.msk.f32.vlgmr.msra.gmra.mxu1 %vm249_vm6, %v236_v36 }
 0x26b   :  { %v335_v43 = vpop.f32.mrf.mxu0  ;;  %v406_v44 = vpop.f32.mrf.mxu1 }
 0x26d   :  { %v337_v46 = vpop.f32.mrf.mxu0  ;;  %v408_v47 = vpop.f32.mrf.mxu1 }
 0x26e   :  { %v561_v48 = vcombine.low %v335_v43, %v337_v46  ;;  %v562_v49 = vcombine.low %v406_v44, %v408_v47 }
 0x26f   :  { %v477_v50 = vpop.f32.mrf.mxu0  ;;  %v548_v51 = vpop.f32.mrf.mxu1 }
 0x270   :  { %v569_v52 = vrot.slane %v561_v48, %v568_v45  ;;  %v576_v53 = vrot.slane %v562_v49, %v568_v45 }
 0x271   :  { %v479_v54 = vpop.f32.mrf.mxu0  ;;  %v550_v55 = vpop.f32.mrf.mxu1 }
 0x272   :  { %v577_v56 = vcombine.low %v569_v52, %v576_v53  ;;  %v578_v57 = vcombine.low %v477_v50, %v479_v54  ;;  %v579_v58 = vcombine.low %v548_v51, %v550_v55 }
 0x274   :  { %597 = vst [vmem:[#allocation10] sm:$0xff] %v577_v56  ;;  %v586_v59 = vrot.slane %v578_v57, %v568_v45  ;;  %v593_v60 = vrot.slane %v579_v58, %v568_v45 }
 0x276   :  { %v594_v61 = vcombine.low %v586_v59, %v593_v60 }
 0x278   :  { %598 = vst [vmem:[#allocation10 + $0x8] sm:$0xff] %v594_v61 }
 0x279   :  { %753 = shalt.err (!%p750_p10)
}
 0x27a   :  { %608 = dma.vmem_to_hbm [thread:$0]  %s606_s3, 256, %s839_s4, [#allocation4]  }
 0x27b   :  { %768 = dma.done.wait [#allocation4], 256  }
 0x27c   :  { %769 = vsyncadd [#allocation4], 4294967040 }
 0x27d   :  { %612 = vsyncpa [#allocation3], 1 }
 0x27e   :  { %613 = vsyncpa [#allocation6], 1 }
 0x27f   :  { %614 = vsyncpa [#allocation9], 1 }
 0x280   :  { %615 = vsyncpa [#allocation4], 1 }

</bundles_post_ra>
